<compile_context>
chip_gen: v5e
topology: v5e:2x2
jax: 0.10.0
libtpu: 0.0.40
codegen_flags: <defaults>
</compile_context>

<pallas_src>
import numpy as np
import jax
import jax.numpy as jnp
from jax.experimental import pallas as pl
from jax.experimental.pallas import tpu as pltpu


def _drop_path_scale_kernel(x_ref, s_ref, o_ref):
    # s_ref broadcasts against x_ref: (1, TC) lane row or (BP, 1) column.
    # Both operands share x's dtype, so the multiply stays in the input dtype.
    o_ref[...] = x_ref[...] * s_ref[...]


def _tpu_vmem_bytes():
    """Physical VMEM per core (generation aware); conservative fallback."""
    try:
        info = pltpu.get_tpu_info()
        cap = int(getattr(info, "vmem_capacity_bytes", 0) or 0)
        if cap > 0:
            return cap
    except Exception:
        pass
    return 64 * 1024 * 1024  # assume the smallest (v7x-class) if unknown


def _budgets():
    """(block budget bytes, vmem_limit cap bytes, physical vmem bytes)."""
    phys = _tpu_vmem_bytes()
    if phys >= 128 * 1024 * 1024:          # v5e / v6e: 128 MiB physical
        return 4 * 1024 * 1024, 64 * 1024 * 1024, phys
    return 3 * 1024 * 1024, 48 * 1024 * 1024, phys   # v7x-class: 64 MiB


def _pick_tile(dim, quantum, max_elems):
    """Tile for one axis: full dim if it fits the budget, else the largest
    multiple of `quantum` <= max_elems (remainder handled by the cdiv grid)."""
    dim = int(dim)
    if dim <= max_elems:
        return dim                      # full axis is always a legal block dim
    return int(max(quantum, (max_elems // quantum) * quantum))


def _pick_tiles_2d(rows, cols, itemsize, budget_bytes):
    budget_elems = max(1, int(budget_bytes) // int(itemsize))
    sub_q = max(8, 32 // int(itemsize))   # 8 for f32, 16 for bf16, 32 for int8
    lane_q = 128
    # Bound the lane tile so the row tile still gets >= one sublane quantum
    # within the budget (keeps the block at ~budget, not 8x over it).
    tc = _pick_tile(cols, lane_q, max(lane_q, budget_elems // sub_q))
    tr = _pick_tile(rows, sub_q, max(sub_q, budget_elems // max(1, tc)))
    return tr, tc, sub_q, lane_q


def _ensure_two_blocks(tr, tc, rows, cols, sub_q, lane_q, itemsize):
    """Megacore parts: make sure non-tiny tensors produce >= 2 grid blocks."""
    if rows * cols * itemsize <= (1 << 20):
        return tr, tc
    if pl.cdiv(rows, tr) * pl.cdiv(cols, tc) >= 2:
        return tr, tc
    if rows >= 2 * sub_q:
        tr = max(sub_q, ((rows // 2) // sub_q) * sub_q)
    elif cols >= 2 * lane_q:
        tc = max(lane_q, ((cols // 2) // lane_q) * lane_q)
    return tr, tc


def drop_path_pallas(x, drop_prob=0.0, training=False, batch_first=False,
                     *, key=None, seed=0, block_budget_bytes=None):
    """Matches torch drop_path(x, drop_prob, training, batch_first) semantics."""
    if drop_prob == 0.0 or not training:
        return x
    if not (0.0 < float(drop_prob) < 1.0):
        raise ValueError(f"drop_prob must be in [0, 1); got {drop_prob}")
    if x.ndim < 2:
        raise ValueError("drop_path expects x with at least 2 dims")

    keep_prob = 1.0 - float(drop_prob)
    if key is None:
        key = jax.random.PRNGKey(seed)

    path_axis = 0 if batch_first else 1
    P = int(x.shape[path_axis])

    # torch: random_tensor = floor(keep_prob + U[0,1)) == 1  iff  U >= drop_prob.
    # Fold the 1/keep_prob rescale into a per-path scale in x's dtype.
    u = jax.random.uniform(key, (P,), dtype=jnp.float32)
    scale = jnp.where(u >= jnp.float32(drop_prob),
                      jnp.float32(1.0 / keep_prob),
                      jnp.float32(0.0)).astype(x.dtype)

    itemsize = int(np.dtype(x.dtype).itemsize)
    budget, vmem_cap, phys = _budgets()
    if block_budget_bytes is not None:
        budget = int(block_budget_bytes)

    if batch_first:
        # (P, *rest) -> (P, M): paths on sublanes, features on lanes.
        M = int(np.prod(x.shape[1:])) if x.ndim > 1 else 1
        x2 = x.reshape(P, M)
        s2 = scale.reshape(P, 1)
        tr, tc, sub_q, lane_q = _pick_tiles_2d(P, M, itemsize, budget)
        tr, tc = _ensure_two_blocks(tr, tc, P, M, sub_q, lane_q, itemsize)
        # Column axis is the fastest grid axis: the (BP, 1) scale block index
        # (i, 0) is constant across it, so its re-DMA is elided.
        grid = (pl.cdiv(P, tr), pl.cdiv(M, tc))
        x_spec = pl.BlockSpec((tr, tc), lambda i, j: (i, j))
        s_spec = pl.BlockSpec((tr, 1), lambda i, j: (i, 0))
        # TODO(synk): for M < 128 the output stores are lane-masked; a truly
        # lane-dense layout would require a transpose, so it is accepted here.
    else:
        # (L, P, *rest) -> (L, N=P*M): lane-dense rows; each path's scale is
        # repeated M times into one lane row broadcast over the L tile.
        L = int(x.shape[0])
        M = int(np.prod(x.shape[2:])) if x.ndim > 2 else 1
        N = P * M
        x2 = x.reshape(L, N)
        s2 = (jnp.repeat(scale, M) if M > 1 else scale).reshape(1, N)
        tr, tc, sub_q, lane_q = _pick_tiles_2d(L, N, itemsize, budget)
        tr, tc = _ensure_two_blocks(tr, tc, L, N, sub_q, lane_q, itemsize)
        # Row axis is the fastest grid axis: the (1, TC) scale block index
        # (0, j) is constant across it, so its re-DMA is elided.
        grid = (pl.cdiv(N, tc), pl.cdiv(L, tr))
        x_spec = pl.BlockSpec((tr, tc), lambda j, i: (i, j))
        s_spec = pl.BlockSpec((1, tc), lambda j, i: (0, j))

    # Scoped-VMEM limit: cover double-buffered in + scale + out with margin,
    # capped below physical VMEM (generation aware).
    x_block_bytes = tr * tc * itemsize
    s_block_bytes = max(tr, tc) * itemsize
    needed = 2 * (2 * x_block_bytes + s_block_bytes) + (2 << 20)
    vmem_limit = int(min(max(needed, 32 << 20),
                         min(vmem_cap, phys - (8 << 20))))

    out2 = pl.pallas_call(
        _drop_path_scale_kernel,
        out_shape=jax.ShapeDtypeStruct(x2.shape, x.dtype),
        grid=grid,
        in_specs=[x_spec, s_spec],
        out_specs=x_spec,
        # Donate the (fresh) reshaped input buffer into the output; skip when
        # the reshape was a no-op and x2 aliases the caller's array.
        input_output_aliases=({0: 0} if x2 is not x else {}),
        compiler_params=pltpu.CompilerParams(
            dimension_semantics=("parallel", "parallel"),
            vmem_limit_bytes=vmem_limit,
        ),
    )(x2, s2)

    return out2.reshape(x.shape)


class DropPath:
    """Thin stateless analogue of the nn.Module (no learnable params)."""

    def __init__(self, drop_prob=None, batch_first=False):
        self.drop_prob = 0.0 if drop_prob is None else float(drop_prob)
        self.batch_first = batch_first
        self.training = True

    def train(self):
        self.training = True
        return self

    def eval(self):
        self.training = False
        return self

    def __call__(self, x, *, key=None, seed=0):
        return drop_path_pallas(x, self.drop_prob, self.training,
                                self.batch_first, key=key, seed=seed)


def _drop_path_ref(x, drop_prob, batch_first, key):
    """Pure-JAX reference using the same mask derivation as the kernel wrapper."""
    keep_prob = 1.0 - float(drop_prob)
    ax = 0 if batch_first else 1
    P = x.shape[ax]
    u = jax.random.uniform(key, (P,), dtype=jnp.float32)
    s = jnp.where(u >= jnp.float32(drop_prob),
                  jnp.float32(1.0 / keep_prob),
                  jnp.float32(0.0)).astype(x.dtype)
    shp = [1] * x.ndim
    shp[ax] = P
    return x * s.reshape(shp)


if __name__ == "__main__":
    key = jax.random.PRNGKey(0)
    # x is (seq L, batch B, channels C); default batch_first=False masks axis 1.
    L, B, C = 8, 2, 32
    x = jax.random.normal(key, (L, B, C), dtype=jnp.float32)
    drop_prob = 0.5

    # eval / drop_prob == 0 paths are identity
    assert jnp.allclose(drop_path_pallas(x, drop_prob, training=False), x)
    assert jnp.allclose(drop_path_pallas(x, 0.0, training=True), x)

    # training, default layout (mask along axis 1)
    k1 = jax.random.PRNGKey(1234)
    mod = DropPath(drop_prob=drop_prob, batch_first=False)
    y = jax.block_until_ready(mod(x, key=k1))
    np.testing.assert_allclose(np.asarray(y),
                               np.asarray(_drop_path_ref(x, drop_prob, False, k1)),
                               rtol=1e-6, atol=1e-6)

    # batch_first=True variant (mask along axis 0)
    k2 = jax.random.PRNGKey(7)
    y2 = jax.block_until_ready(
        drop_path_pallas(x, drop_prob, True, batch_first=True, key=k2))
    np.testing.assert_allclose(np.asarray(y2),
                               np.asarray(_drop_path_ref(x, drop_prob, True, k2)),
                               rtol=1e-6, atol=1e-6)

    # bf16 input: scale folded into the input dtype, output stays bf16
    k3 = jax.random.PRNGKey(3)
    xb = x.astype(jnp.bfloat16)
    y3 = jax.block_until_ready(drop_path_pallas(xb, 0.25, True, key=k3))
    assert y3.dtype == jnp.bfloat16
    np.testing.assert_allclose(np.asarray(y3, dtype=np.float32),
                               np.asarray(_drop_path_ref(xb, 0.25, False, k3),
                                          dtype=np.float32),
                               rtol=1e-2, atol=1e-2)

    # force a tiny block budget to exercise multi-block grids + remainder rows
    k4 = jax.random.PRNGKey(11)
    xt = jax.random.normal(jax.random.PRNGKey(5), (20, 3, 40), dtype=jnp.float32)
    y4 = jax.block_until_ready(
        drop_path_pallas(xt, 0.3, True, key=k4, block_budget_bytes=4096))
    np.testing.assert_allclose(np.asarray(y4),
                               np.asarray(_drop_path_ref(xt, 0.3, False, k4)),
                               rtol=1e-6, atol=1e-6)

    print("KERNEL_OK")
</pallas_src>

<mosaic_0001>
module attributes {stable_mosaic.version = 11 : i64} {
  func.func @_drop_path_scale_kernel(%arg0: i32, %arg1: i32, %arg2: memref<8x64xf32, #tpu.memory_space<vmem>>, %arg3: memref<1x64xf32, #tpu.memory_space<vmem>>, %arg4: memref<8x64xf32, #tpu.memory_space<vmem>>) attributes {dimension_semantics = [#tpu.dimension_semantics<parallel>, #tpu.dimension_semantics<parallel>], iteration_bounds = array<i64: 1, 1>, scalar_prefetch = 0 : i64, scratch_operands = 0 : i64, tpu.core_type = #tpu.core_type<tc>, window_params = [{transform_indices = @transform_0, window_bounds = array<i64: 8, 64>}, {transform_indices = @transform_1, window_bounds = array<i64: 1, 64>}, {transform_indices = @transform_2, window_bounds = array<i64: 8, 64>}]} {
    %c0 = arith.constant 0 : index
    %c0_0 = arith.constant 0 : index
    %0 = vector.load %arg2[%c0, %c0_0] : memref<8x64xf32, #tpu.memory_space<vmem>>, vector<8x64xf32>
    %c0_1 = arith.constant 0 : index
    %c0_2 = arith.constant 0 : index
    %1 = vector.load %arg3[%c0_1, %c0_2] : memref<1x64xf32, #tpu.memory_space<vmem>>, vector<1x64xf32>
    %2 = vector.broadcast %1 : vector<1x64xf32> to vector<8x64xf32>
    %3 = arith.mulf %0, %2 : vector<8x64xf32>
    %c0_3 = arith.constant 0 : index
    %c0_4 = arith.constant 0 : index
    %4 = vector.load %arg4[%c0_3, %c0_4] : memref<8x64xf32, #tpu.memory_space<vmem>>, vector<8x64xf32>
    tpu.vector_store %arg4[%c0_3, %c0_4], %3 {strides = array<i32>} : memref<8x64xf32, #tpu.memory_space<vmem>>, vector<8x64xf32>,
    return
  }
  func.func @transform_0(%arg0: i32, %arg1: i32) -> (i32, i32) {
    %c0_i32 = arith.constant 0 : i32
    return %arg1, %arg0 : i32, i32
  }
  func.func @transform_1(%arg0: i32, %arg1: i32) -> (i32, i32) {
    %c0_i32 = arith.constant 0 : i32
    %c0_i32_0 = arith.constant 0 : i32
    return %c0_i32, %arg0 : i32, i32
  }
  func.func @transform_2(%arg0: i32, %arg1: i32) -> (i32, i32) {
    %c0_i32 = arith.constant 0 : i32
    return %arg1, %arg0 : i32, i32
  }
}

</mosaic_0001>

<bundles_post_ra>
// kernel: tpu_custom_call.1
= control target key start
LH: loop header
LB: loop body
LE: loop exit
PB: predicated region body
PF: predicated region fallthrough
CT: control target
= control target key end

     0   :  { %7 = vsyncpa [#allocation3], 0  ;;  %s132_s0 = inlined_call_operand.hbm [shape: f32[8,64], index: 0, kind: input, shape index: {}, may-alias: {0,2}]   ;;  %s133_s1 = inlined_call_operand.vmem [shape: f32[1,64], index: 1, kind: input, shape index: {}]   ;;  %s134_s2 = inlined_call_operand.hbm [shape: f32[8,64], index: 2, kind: output, shape index: {}, may-alias: {0,2}]  }
   0x1   :  { %8 = vsyncpa [#allocation4], 0  ;;  %s14_s11 = sshll.u32 %s132_s0, 4  ;;  %s106_s12 = smov [#allocation2]   ;;  %s15_s11 = int_to_ptr.hbm [resolvable:$true] %s14_s11 }
   0x2   :  { %s16_s13 = sshll.u32 %s106_s12, 4  ;;  %s17_s13 = int_to_ptr.vmem [resolvable:$true] %s16_s13 }
   0x3   :  { %19 = dma.hbm_to_vmem [thread:$0]  %s15_s11, 128, %s17_s13, [#allocation3]  }
   0x4   :  { %102 = dma.done.wait [#allocation3], 128  }
   0x5   :  { %103 = vsyncadd [#allocation3], 4294967168  ;;  %s107_s14 = smov [#allocation5]   ;;  %s41_s18 = sshll.u32 %s134_s2, 4  ;;  %v26_v0 = vld [vmem:[#allocation2] sm:$0xff]  ;;  %vm32_vm0 = vcmask 523264   ;;  %s42_s18 = int_to_ptr.hbm [resolvable:$true] %s41_s18 }
   0x6   :  { %s39_s15 = sshll.u32 %s107_s14, 4  ;;  %v53_v1 = vld [vmem:[%s133_s1] ss:$0 sm:$0xff]  ;;  %s40_s15 = int_to_ptr.vmem [resolvable:$true] %s39_s15 }
   0x7   :  { %v31_v2 = vmul.f32 %v53_v1, %v26_v0 }
   0x9   :  { %33 = vst.msk [vmem:[#allocation5] sm:$0xff] %vm32_vm0, %v31_v2 }
   0xa   :  { %44 = dma.vmem_to_hbm [thread:$0]  %s40_s15, 128, %s42_s18, [#allocation4]  }
   0xb   :  { %104 = dma.done.wait [#allocation4], 128  }
   0xc   :  { %105 = vsyncadd [#allocation4], 4294967168 }
   0xd   :  { %49 = vsyncpa [#allocation3], 1 }
   0xe   :  { %50 = vsyncpa [#allocation4], 1 }

</bundles_post_ra>
